<compile_context>
chip_gen: v7x
topology: tpu7x:2x2x1
jax: 0.10.0
libtpu: 0.0.40
codegen_flags: <defaults>
</compile_context>

<pallas_src>
import functools

import jax
import jax.numpy as jnp
from jax.experimental import pallas as pl
from jax.experimental.pallas import tpu as pltpu


def _round_up(x, m):
    return (x + m - 1) // m * m


def _num_parallel_grid_steps():
    """2 parallel batch tiles on multi-TensorCore v7x, else 1 (v5e/v6e)."""
    try:
        kind = jax.devices()[0].device_kind.lower()
    except Exception:
        return 1
    return 2 if ("v7" in kind or "7x" in kind) else 1


def deep_nn0_kernel(idx_ref, wa_ref, b1_ref, w2_ref, b2_ref, out_ref):
    Bt, S = idx_ref.shape          # batch tile, sequence length (static)
    Vp = wa_ref.shape[0]           # padded vocabulary

    idx = idx_ref[...]                                             # (Bt, S) int32
    iota_v = jax.lax.broadcasted_iota(jnp.int32, (Bt, Vp), 1)      # (Bt, Vp)

    # One-hot counts over the sequence axis: pairwise tree-sum in int32, single
    # convert to f32 at the end (short VALU critical path, no per-step convert).
    masks = [(iota_v == idx[:, s:s + 1]).astype(jnp.int32) for s in range(S)]
    while len(masks) > 1:
        nxt = [a + b for a, b in zip(masks[0::2], masks[1::2])]
        if len(masks) % 2:
            nxt.append(masks[-1])
        masks = nxt
    counts = masks[0].astype(jnp.float32)                          # (Bt, Vp)

    # fc1 + ReLU on the folded weight W_a = (emb @ w1.T) / S    (MXU + VPU)
    h = jnp.dot(counts, wa_ref[...],
                preferred_element_type=jnp.float32) + b1_ref[...]  # (Bt, Hp)
    h = jnp.maximum(h, 0.0)

    # fc2 -> lane-dense (Bt, Cp=128) store; wrapper slices to the real C.
    out_ref[...] = jnp.dot(h, w2_ref[...],
                           preferred_element_type=jnp.float32) + b2_ref[...]


def prepare_params(emb, w1, b1, w2, b2, seq_len):
    """Fold + pad torch-layout params once to MXU/vreg-friendly shapes.

    emb: (V, E); w1: (H, E); b1: (H,); w2: (C, H); b2: (C,); seq_len: S.
    Returns W_a = (emb @ w1.T)/S padded to (Vp, Hp), pre-transposed fc2 weight
    (Hp, Cp), biases (1, Hp)/(1, Cp), and the true number of classes C.
    """
    V, E = emb.shape
    H, _ = w1.shape
    C, _ = w2.shape
    Vp, Hp, Cp = (_round_up(d, 128) for d in (V, H, C))

    # mean_embeds @ w1.T == counts @ ((emb @ w1.T) / S)  -- exact up to f32 rounding.
    wa = (emb @ w1.T) * (1.0 / seq_len)                       # (V, H)
    wa_p = jnp.zeros((Vp, Hp), jnp.float32).at[:V, :H].set(wa)
    b1_p = jnp.zeros((1, Hp), jnp.float32).at[0, :H].set(b1)
    w2_p = jnp.zeros((Hp, Cp), jnp.float32).at[:H, :C].set(w2.T)
    b2_p = jnp.zeros((1, Cp), jnp.float32).at[0, :C].set(b2)
    return wa_p, b1_p, w2_p, b2_p, C


@functools.partial(jax.jit, static_argnames=("n_classes", "block_b"))
def deep_nn0_forward(idx, wa_p, b1_p, w2_p, b2_p, *, n_classes, block_b=None):
    """idx: (B, S) int32 word indices. Returns logits (B, n_classes) float32."""
    B, S = idx.shape
    Vp, Hp = wa_p.shape
    Cp = w2_p.shape[1]

    # Batch tile: one grid step on single-TC chips, two on v7x; always a
    # multiple of 8 sublanes regardless of caller-supplied block_b.
    if block_b is None:
        bb = _round_up(pl.cdiv(B, _num_parallel_grid_steps()), 8)
    else:
        bb = _round_up(min(block_b, _round_up(B, 8)), 8)
    Bp = _round_up(B, bb)
    idx_p = idx if Bp == B else jnp.pad(idx, ((0, Bp - B), (0, 0)))

    grid = (Bp // bb,)
    cost = pl.CostEstimate(
        flops=2 * Bp * Vp * Hp + 2 * Bp * Hp * Cp,
        transcendentals=0,
        bytes_accessed=(idx_p.size * 4
                        + (Vp * Hp + Hp + Hp * Cp + Cp) * 4
                        + Bp * Cp * 4),
    )

    out_p = pl.pallas_call(
        deep_nn0_kernel,
        out_shape=jax.ShapeDtypeStruct((Bp, Cp), jnp.float32),
        grid_spec=pltpu.PrefetchScalarGridSpec(
            num_scalar_prefetch=0,
            grid=grid,
            in_specs=[
                pl.BlockSpec((bb, S), lambda i: (i, 0)),    # idx: tiled over batch
                pl.BlockSpec((Vp, Hp), lambda i: (0, 0)),   # folded emb@w1: resident
                pl.BlockSpec((1, Hp), lambda i: (0, 0)),    # b1: resident
                pl.BlockSpec((Hp, Cp), lambda i: (0, 0)),   # w2: resident
                pl.BlockSpec((1, Cp), lambda i: (0, 0)),    # b2: resident
            ],
            out_specs=pl.BlockSpec((bb, Cp), lambda i: (i, 0)),
        ),
        compiler_params=pltpu.CompilerParams(
            dimension_semantics=("parallel",),          # megacore split on v7x
            vmem_limit_bytes=32 * 1024 * 1024,          # ample headroom, all gens
        ),
        cost_estimate=cost,
    )(idx_p, wa_p, b1_p, w2_p, b2_p)

    return out_p[:B, :n_classes]


def init_params(key, dictionary_length, n_embeddings, n_hidden, n_classes):
    """Torch-layout parameters matching deep_nn_0's initialization."""
    k_emb, k_w1, k_b1, k_w2, k_b2 = jax.random.split(key, 5)
    # nn.Embedding: N(0, 1), padding_idx=0 row zeroed.
    emb = jax.random.normal(k_emb, (dictionary_length, n_embeddings), jnp.float32)
    emb = emb.at[0].set(0.0)
    # nn.Linear default init: U(-1/sqrt(fan_in), 1/sqrt(fan_in)).
    lim1 = 1.0 / jnp.sqrt(n_embeddings)
    w1 = jax.random.uniform(k_w1, (n_hidden, n_embeddings), jnp.float32, -lim1, lim1)
    b1 = jax.random.uniform(k_b1, (n_hidden,), jnp.float32, -lim1, lim1)
    lim2 = 1.0 / jnp.sqrt(n_hidden)
    w2 = jax.random.uniform(k_w2, (n_classes, n_hidden), jnp.float32, -lim2, lim2)
    b2 = jax.random.uniform(k_b2, (n_classes,), jnp.float32, -lim2, lim2)
    return emb, w1, b1, w2, b2


def reference_forward(idx, emb, w1, b1, w2, b2):
    embeds = emb[idx]                       # (B, S, E)
    mean_embeds = jnp.mean(embeds, axis=1)  # (B, E)
    h = jnp.maximum(mean_embeds @ w1.T + b1, 0.0)
    return h @ w2.T + b2


if __name__ == "__main__":
    dictionary_length = 64
    n_embeddings = 32
    n_hidden = 32
    n_classes = 2
    batch = 64      # module's batch_size
    seq = 8         # module uses 50-word sentences; kept small per instructions

    key = jax.random.PRNGKey(0)
    k_params, k_idx = jax.random.split(key)
    emb, w1, b1, w2, b2 = init_params(
        k_params, dictionary_length, n_embeddings, n_hidden, n_classes)

    idx = jax.random.randint(k_idx, (batch, seq), 0, dictionary_length, jnp.int32)

    wa_p, b1_p, w2_p, b2_p, C = prepare_params(emb, w1, b1, w2, b2, seq_len=seq)

    # block_b=None -> 1 grid step on v5e/v6e, 2 parallel steps on v7x.
    out = deep_nn0_forward(idx, wa_p, b1_p, w2_p, b2_p, n_classes=C)
    out = jax.block_until_ready(out)

    ref = reference_forward(idx, emb, w1, b1, w2, b2)
    assert out.shape == (batch, n_classes)
    assert jnp.allclose(out, ref, atol=1e-4, rtol=1e-4)

    print("KERNEL_OK")
</pallas_src>

<mosaic_0001>
module attributes {stable_mosaic.version = 11 : i64} {
  func.func @deep_nn0_kernel(%arg0: i32, %arg1: memref<64x8xi32, #tpu.memory_space<vmem>>, %arg2: memref<128x128xf32, #tpu.memory_space<vmem>>, %arg3: memref<1x128xf32, #tpu.memory_space<vmem>>, %arg4: memref<128x128xf32, #tpu.memory_space<vmem>>, %arg5: memref<1x128xf32, #tpu.memory_space<vmem>>, %arg6: memref<64x128xf32, #tpu.memory_space<vmem>>) attributes {dimension_semantics = [#tpu.dimension_semantics<parallel>], iteration_bounds = array<i64: 1>, scalar_prefetch = 0 : i64, scratch_operands = 0 : i64, tpu.core_type = #tpu.core_type<tc>, window_params = [{transform_indices = @transform_0, window_bounds = array<i64: 64, 8>}, {pipeline_mode = #tpu.pipeline_mode<synchronous>, transform_indices = @transform_1, window_bounds = array<i64: 128, 128>}, {pipeline_mode = #tpu.pipeline_mode<synchronous>, transform_indices = @transform_2, window_bounds = array<i64: 1, 128>}, {pipeline_mode = #tpu.pipeline_mode<synchronous>, transform_indices = @transform_3, window_bounds = array<i64: 128, 128>}, {pipeline_mode = #tpu.pipeline_mode<synchronous>, transform_indices = @transform_4, window_bounds = array<i64: 1, 128>}, {transform_indices = @transform_5, window_bounds = array<i64: 64, 128>}]} {
    %c0 = arith.constant 0 : index
    %c0_0 = arith.constant 0 : index
    %0 = vector.load %arg1[%c0, %c0_0] : memref<64x8xi32, #tpu.memory_space<vmem>>, vector<64x8xi32>
    %1 = tpu.iota {dimensions = array<i32: 1>} : vector<64x128xi32>
    %2 = vector.extract_strided_slice %0 {offsets = [0, 0], sizes = [64, 1], strides = [1, 1]} : vector<64x8xi32> to vector<64x1xi32>
    %3 = vector.broadcast %2 : vector<64x1xi32> to vector<64x128xi32>
    %4 = arith.cmpi eq, %1, %3 : vector<64x128xi32>
    %5 = arith.extui %4 : vector<64x128xi1> to vector<64x128xi32>
    %6 = vector.extract_strided_slice %0 {offsets = [0, 1], sizes = [64, 1], strides = [1, 1]} : vector<64x8xi32> to vector<64x1xi32>
    %7 = vector.broadcast %6 : vector<64x1xi32> to vector<64x128xi32>
    %8 = arith.cmpi eq, %1, %7 : vector<64x128xi32>
    %9 = arith.extui %8 : vector<64x128xi1> to vector<64x128xi32>
    %10 = vector.extract_strided_slice %0 {offsets = [0, 2], sizes = [64, 1], strides = [1, 1]} : vector<64x8xi32> to vector<64x1xi32>
    %11 = vector.broadcast %10 : vector<64x1xi32> to vector<64x128xi32>
    %12 = arith.cmpi eq, %1, %11 : vector<64x128xi32>
    %13 = arith.extui %12 : vector<64x128xi1> to vector<64x128xi32>
    %14 = vector.extract_strided_slice %0 {offsets = [0, 3], sizes = [64, 1], strides = [1, 1]} : vector<64x8xi32> to vector<64x1xi32>
    %15 = vector.broadcast %14 : vector<64x1xi32> to vector<64x128xi32>
    %16 = arith.cmpi eq, %1, %15 : vector<64x128xi32>
    %17 = arith.extui %16 : vector<64x128xi1> to vector<64x128xi32>
    %18 = vector.extract_strided_slice %0 {offsets = [0, 4], sizes = [64, 1], strides = [1, 1]} : vector<64x8xi32> to vector<64x1xi32>
    %19 = vector.broadcast %18 : vector<64x1xi32> to vector<64x128xi32>
    %20 = arith.cmpi eq, %1, %19 : vector<64x128xi32>
    %21 = arith.extui %20 : vector<64x128xi1> to vector<64x128xi32>
    %22 = vector.extract_strided_slice %0 {offsets = [0, 5], sizes = [64, 1], strides = [1, 1]} : vector<64x8xi32> to vector<64x1xi32>
    %23 = vector.broadcast %22 : vector<64x1xi32> to vector<64x128xi32>
    %24 = arith.cmpi eq, %1, %23 : vector<64x128xi32>
    %25 = arith.extui %24 : vector<64x128xi1> to vector<64x128xi32>
    %26 = vector.extract_strided_slice %0 {offsets = [0, 6], sizes = [64, 1], strides = [1, 1]} : vector<64x8xi32> to vector<64x1xi32>
    %27 = vector.broadcast %26 : vector<64x1xi32> to vector<64x128xi32>
    %28 = arith.cmpi eq, %1, %27 : vector<64x128xi32>
    %29 = arith.extui %28 : vector<64x128xi1> to vector<64x128xi32>
    %30 = vector.extract_strided_slice %0 {offsets = [0, 7], sizes = [64, 1], strides = [1, 1]} : vector<64x8xi32> to vector<64x1xi32>
    %31 = vector.broadcast %30 : vector<64x1xi32> to vector<64x128xi32>
    %32 = arith.cmpi eq, %1, %31 : vector<64x128xi32>
    %33 = arith.extui %32 : vector<64x128xi1> to vector<64x128xi32>
    %34 = arith.addi %5, %9 : vector<64x128xi32>
    %35 = arith.addi %13, %17 : vector<64x128xi32>
    %36 = arith.addi %21, %25 : vector<64x128xi32>
    %37 = arith.addi %29, %33 : vector<64x128xi32>
    %38 = arith.addi %34, %35 : vector<64x128xi32>
    %39 = arith.addi %36, %37 : vector<64x128xi32>
    %40 = arith.addi %38, %39 : vector<64x128xi32>
    %41 = arith.sitofp %40 : vector<64x128xi32> to vector<64x128xf32>
    %c0_1 = arith.constant 0 : index
    %c0_2 = arith.constant 0 : index
    %42 = vector.load %arg2[%c0_1, %c0_2] : memref<128x128xf32, #tpu.memory_space<vmem>>, vector<128x128xf32>
    %cst = arith.constant dense<0.000000e+00> : vector<64x128xf32>
    %43 = tpu.matmul %41, %42, %cst {dimension_numbers = #tpu.dot_dimension_numbers<[1], [0], [0], [1], [0, 0, 1, 1], [], []>} : vector<64x128xf32>, vector<128x128xf32>, vector<64x128xf32> -> vector<64x128xf32>
    %c0_3 = arith.constant 0 : index
    %c0_4 = arith.constant 0 : index
    %44 = vector.load %arg3[%c0_3, %c0_4] : memref<1x128xf32, #tpu.memory_space<vmem>>, vector<1x128xf32>
    %45 = vector.broadcast %44 : vector<1x128xf32> to vector<64x128xf32>
    %46 = arith.addf %43, %45 : vector<64x128xf32>
    %cst_5 = arith.constant 0.000000e+00 : f32
    %47 = vector.broadcast %cst_5 : f32 to vector<64x128xf32>
    %48 = arith.maximumf %46, %47 : vector<64x128xf32>
    %c0_6 = arith.constant 0 : index
    %c0_7 = arith.constant 0 : index
    %49 = vector.load %arg4[%c0_6, %c0_7] : memref<128x128xf32, #tpu.memory_space<vmem>>, vector<128x128xf32>
    %cst_8 = arith.constant dense<0.000000e+00> : vector<64x128xf32>
    %50 = tpu.matmul %48, %49, %cst_8 {dimension_numbers = #tpu.dot_dimension_numbers<[1], [0], [0], [1], [0, 0, 1, 1], [], []>} : vector<64x128xf32>, vector<128x128xf32>, vector<64x128xf32> -> vector<64x128xf32>
    %c0_9 = arith.constant 0 : index
    %c0_10 = arith.constant 0 : index
    %51 = vector.load %arg5[%c0_9, %c0_10] : memref<1x128xf32, #tpu.memory_space<vmem>>, vector<1x128xf32>
    %52 = vector.broadcast %51 : vector<1x128xf32> to vector<64x128xf32>
    %53 = arith.addf %50, %52 : vector<64x128xf32>
    %c0_11 = arith.constant 0 : index
    %c0_12 = arith.constant 0 : index
    %54 = vector.load %arg6[%c0_11, %c0_12] : memref<64x128xf32, #tpu.memory_space<vmem>>, vector<64x128xf32>
    tpu.vector_store %arg6[%c0_11, %c0_12], %53 {strides = array<i32>} : memref<64x128xf32, #tpu.memory_space<vmem>>, vector<64x128xf32>,
    return
  }
  func.func @transform_0(%arg0: i32) -> (i32, i32) {
    %c0_i32 = arith.constant 0 : i32
    %c0_i32_0 = arith.constant 0 : i32
    return %arg0, %c0_i32 : i32, i32
  }
  func.func @transform_1(%arg0: i32) -> (i32, i32) {
    %c0_i32 = arith.constant 0 : i32
    %c0_i32_0 = arith.constant 0 : i32
    %c0_i32_1 = arith.constant 0 : i32
    return %c0_i32, %c0_i32_0 : i32, i32
  }
  func.func @transform_2(%arg0: i32) -> (i32, i32) {
    %c0_i32 = arith.constant 0 : i32
    %c0_i32_0 = arith.constant 0 : i32
    %c0_i32_1 = arith.constant 0 : i32
    return %c0_i32, %c0_i32_0 : i32, i32
  }
  func.func @transform_3(%arg0: i32) -> (i32, i32) {
    %c0_i32 = arith.constant 0 : i32
    %c0_i32_0 = arith.constant 0 : i32
    %c0_i32_1 = arith.constant 0 : i32
    return %c0_i32, %c0_i32_0 : i32, i32
  }
  func.func @transform_4(%arg0: i32) -> (i32, i32) {
    %c0_i32 = arith.constant 0 : i32
    %c0_i32_0 = arith.constant 0 : i32
    %c0_i32_1 = arith.constant 0 : i32
    return %c0_i32, %c0_i32_0 : i32, i32
  }
  func.func @transform_5(%arg0: i32) -> (i32, i32) {
    %c0_i32 = arith.constant 0 : i32
    %c0_i32_0 = arith.constant 0 : i32
    return %arg0, %c0_i32 : i32, i32
  }
}

</mosaic_0001>

<bundles_post_ra>
// kernel: deep_nn0_forward.1
= control target key start
LH: loop header
LB: loop body
LE: loop exit
PB: predicated region body
PF: predicated region fallthrough
CT: control target
= control target key end

     0   :  { %10 = vsyncpa [#allocation3], 0  ;;  %s1485_s0 = inlined_call_operand.vmem [shape: s32[64,8], index: 0, kind: input, shape index: {}]   ;;  %s1486_s1 = inlined_call_operand.hbm [shape: f32[128,128], index: 1, kind: input, shape index: {}]   ;;  %s1487_s2 = inlined_call_operand.vmem [shape: f32[1,128], index: 2, kind: input, shape index: {}]   ;;  %s1488_s3 = inlined_call_operand.hbm [shape: f32[128,128], index: 3, kind: input, shape index: {}]   ;;  %s1489_s4 = inlined_call_operand.vmem [shape: f32[1,128], index: 4, kind: input, shape index: {}]   ;;  %s1490_s5 = inlined_call_operand.vmem [shape: f32[64,128], index: 5, kind: output, shape index: {}]  }
   0x1   :  { %11 = vsyncpa [#allocation5], 0  ;;  %s1034_s18 = smov [#allocation2]   ;;  %s986_s22 = scalar_lea.hbm %s1486_s1, 2048 }
   0x2   :  { %s19_s19 = sshll.u32 %s1034_s18, 4  ;;  %p987_p0 = scmp.ne.s32.totalorder %s1486_s1, %s986_s22  ;;  %s20_s19 = int_to_ptr.vmem [resolvable:$true] %s19_s19 }
   0x3   :  { %p990_p1 = scmp.lt.u32.totalorder %s986_s22, %s1486_s1 }
   0x5   :  { %p992_p2 = pnand %p990_p1, %p987_p0 }
   0x7   :  { %995 = shalt.err (!%p992_p2)
}
   0x8   :  { %s996_s27 = scalar_lea.vmem %s20_s19, 2048  ;;  %p1001_p4 = scmp.lt.s32.totalorder %s20_s19, %s20_s19 }
   0x9   :  { %p997_p3 = scmp.ne.s32.totalorder %s20_s19, %s996_s27  ;;  %p1002_p5 = scmp.lt.s32.totalorder %s996_s27, %s996_s27 }
   0xb   :  { %p1003_p6 = por %p1002_p5, %p1001_p4 }
   0xd   :  { %p1004_p7 = pnand %p1003_p6, %p997_p3 }
   0xf   :  { %1007 = shalt.err (!%p1004_p7)
}
  0x10   :  { %s1035_s28 = smov 128   ;;  %s1036_s29 = smov 8  }
  0x11   :  { %25 = dma.hbm_to_vmem [thread:$0]  %s1486_s1, 2048, %s20_s19, [#allocation3], %s1035_s28, %s1035_s28, %s1036_s29  }
  0x12   :  { %s1037_s7 = smov [#allocation4]   ;;  %s1008_s11 = scalar_lea.hbm %s1488_s3, 2048 }
  0x13   :  { %s33_s8 = sshll.u32 %s1037_s7, 4  ;;  %p1009_p8 = scmp.ne.s32.totalorder %s1488_s3, %s1008_s11  ;;  %s34_s8 = int_to_ptr.vmem [resolvable:$true] %s33_s8 }
  0x14   :  { %p1012_p9 = scmp.lt.u32.totalorder %s1008_s11, %s1488_s3 }
  0x16   :  { %p1014_p10 = pnand %p1012_p9, %p1009_p8 }
  0x18   :  { %1017 = shalt.err (!%p1014_p10)
}
  0x19   :  { %s1018_s16 = scalar_lea.vmem %s34_s8, 2048  ;;  %p1023_p12 = scmp.lt.s32.totalorder %s34_s8, %s34_s8 }
  0x1a   :  { %p1019_p11 = scmp.ne.s32.totalorder %s34_s8, %s1018_s16  ;;  %p1024_p13 = scmp.lt.s32.totalorder %s1018_s16, %s1018_s16 }
  0x1c   :  { %p1025_p0 = por %p1024_p13, %p1023_p12 }
  0x1e   :  { %p1026_p1 = pnand %p1025_p0, %p1019_p11 }
  0x20   :  { %1029 = shalt.err (!%p1026_p1)
}
  0x21   :  { %39 = dma.hbm_to_vmem [thread:$0]  %s1488_s3, 2048, %s34_s8, [#allocation5], %s1035_s28, %s1035_s28, %s1036_s29  }
  0x22   :  { %1030 = dma.done.wait [#allocation3], 2048  }
  0x23   :  { %1031 = vsyncadd [#allocation3], 4294965248 }
  0x24   :  { %1032 = dma.done.wait [#allocation5], 2048  }
  0x25   :  { %1033 = vsyncadd [#allocation5], 4294965248  ;;  %v1038_v0 = vmov 6   ;;  %v1039_v1 = vmov 2   ;;  %v1105_v2 = vld [vmem:[%s1485_s0 + $0x8] sm:$0xff]  ;;  %v1110_v3 = vld [vmem:[%s1485_s0] sm:$0xff]  ;;  %v56_v63 = vlaneseq }
  0x26   :  { %943 = vset.pattern.permute.xlu0 %v1038_v0  ;;  %934 = vset.pattern.permute.xlu1 %v1039_v1  ;;  %v1117_v4 = vld [vmem:[%s1485_s0 + $0x20] sm:$0xff]  ;;  %v1040_v5 = vmov 3   ;;  %v1041_v6 = vmov 1   ;;  %v1042_v7 = vmov 4   ;;  %v1129_v8 = vld [vmem:[%s1485_s0 + $0x10] sm:$0xff]  ;;  %v1136_v9 = vld [vmem:[%s1485_s0 + $0x28] sm:$0xff] }
  0x27   :  { %302 = vperm.xlu0 %943, %v1105_v2   ;;  %139 = vperm.xlu1 %934, %v1110_v3   ;;  %v1043_v10 = vmov 7   ;;  %v1157_v11 = vld [vmem:[%s1485_s0 + $0x18] sm:$0xff]  ;;  %v1044_v12 = vmov 5   ;;  %v1166_v13 = vld [vmem:[%s1485_s0 + $0x30] sm:$0xff]  ;;  %v1045_v14 = vmov 0   ;;  %v442_v15 = vld [vmem:[#allocation2] sm:$0xff] }
  0x28   :  { %v443_v16 = vld [vmem:[#allocation2 + $0x8] sm:$0xff]  ;;  %v444_v18 = vld [vmem:[#allocation2 + $0x10] sm:$0xff]  ;;  %v445_v19 = vld [vmem:[#allocation2 + $0x18] sm:$0xff] }
  0x29   :  { %v858_v17 = vpack.c.bf16 %v443_v16, %v442_v15  ;;  %v862_v20 = vpack.c.bf16 %v445_v19, %v444_v18  ;;  %v446_v21 = vld [vmem:[#allocation2 + $0x20] sm:$0xff]  ;;  %v447_v22 = vld [vmem:[#allocation2 + $0x28] sm:$0xff]  ;;  %v448_v24 = vld [vmem:[#allocation2 + $0x30] sm:$0xff] }
  0x2a   :  { %v866_v23 = vpack.c.bf16 %v447_v22, %v446_v21  ;;  %v449_v25 = vld [vmem:[#allocation2 + $0x38] sm:$0xff]  ;;  %v450_v27 = vld [vmem:[#allocation2 + $0x40] sm:$0xff]  ;;  %v451_v28 = vld [vmem:[#allocation2 + $0x48] sm:$0xff] }
  0x2b   :  { %311 = vperm.xlu0 %943, %v1117_v4   ;;  %935 = vset.pattern.permute.xlu1 %v1040_v5  ;;  %v870_v26 = vpack.c.bf16 %v449_v25, %v448_v24  ;;  %v1192_v29 = vld [vmem:[%s1485_s0 + $0x38] sm:$0xff]  ;;  %v874_v30 = vpack.c.bf16 %v451_v28, %v450_v27  ;;  %v452_v31 = vld [vmem:[#allocation2 + $0x50] sm:$0xff]  ;;  %v454_v34 = vld [vmem:[#allocation2 + $0x60] sm:$0xff] }
  0x2c   :  { %179 = vperm.xlu1 %935, %v1110_v3   ;;  %859 = vmatprep.subr.bf16.mxu0 %v858_v17  ;;  %v453_v32 = vld [vmem:[#allocation2 + $0x58] sm:$0xff]  ;;  %v455_v35 = vld [vmem:[#allocation2 + $0x68] sm:$0xff]  ;;  %v456_v37 = vld [vmem:[#allocation2 + $0x70] sm:$0xff] }
  0x2d   :  { %861 = vmatpush3.bf16.msra.mxu0 %v858_v17  ;;  %v878_v33 = vpack.c.bf16 %v453_v32, %v452_v31  ;;  %v882_v36 = vpack.c.bf16 %v455_v35, %v454_v34  ;;  %v457_v38 = vld [vmem:[#allocation2 + $0x78] sm:$0xff] }
  0x2e   :  { %863 = vmatprep.subr.bf16.mxu0 %v862_v20  ;;  %v886_v39 = vpack.c.bf16 %v457_v38, %v456_v37 }
  0x2f   :  { %960 = vset.pattern.permute.xlu0 %v1041_v6 }
  0x30   :  { %99 = vperm.xlu0 %960, %v1110_v3   ;;  %936 = vset.pattern.permute.xlu1 %v1042_v7 }
  0x31   :  { %219 = vperm.xlu1 %936, %v1110_v3   ;;  %865 = vmatpush3.bf16.msra.mxu0 %v862_v20 }
  0x32   :  { %867 = vmatprep.subr.bf16.mxu0 %v866_v23 }
  0x34   :  { %105 = vperm.xlu0 %960, %v1129_v8  }
  0x35   :  { %937 = vset.pattern.permute.xlu1 %v1038_v0  ;;  %869 = vmatpush3.bf16.msra.mxu0 %v866_v23 }
  0x36   :  { %299 = vperm.xlu1 %937, %v1110_v3   ;;  %871 = vmatprep.subr.bf16.mxu0 %v870_v26 }
  0x38   :  { %114 = vperm.xlu0 %960, %v1136_v9  }
  0x39   :  { %873 = vmatpush3.bf16.msra.mxu0 %v870_v26 }
  0x3a   :  { %938 = vset.pattern.permute.xlu1 %v1043_v10  ;;  %875 = vmatprep.subr.bf16.mxu0 %v874_v30 }
  0x3b   :  { %339 = vperm.xlu1 %938, %v1110_v3  }
  0x3c   :  { %963 = vset.pattern.permute.xlu0 %v1042_v7 }
  0x3d   :  { %225 = vperm.xlu0 %963, %v1129_v8   ;;  %877 = vmatpush3.bf16.msra.mxu0 %v874_v30 }
  0x3e   :  { %879 = vmatprep.subr.bf16.mxu0 %v878_v33 }
  0x3f   :  { %939 = vset.pattern.permute.xlu1 %v1041_v6 }
  0x40   :  { %102 = vperm.xlu1 %939, %v1105_v2  }
  0x41   :  { %234 = vperm.xlu0 %963, %v1136_v9   ;;  %881 = vmatpush3.bf16.msra.mxu0 %v878_v33 }
  0x42   :  { %883 = vmatprep.subr.bf16.mxu0 %v882_v36 }
  0x44   :  { %940 = vset.pattern.permute.xlu1 %v1039_v1 }
  0x45   :  { %966 = vset.pattern.permute.xlu0 %v1043_v10  ;;  %142 = vperm.xlu1 %940, %v1105_v2  }
  0x46   :  { %345 = vperm.xlu0 %966, %v1129_v8   ;;  %885 = vmatpush3.bf16.msra.mxu0 %v882_v36 }
  0x47   :  { %887 = vmatprep.subr.bf16.mxu0 %v886_v39 }
  0x49   :  { %941 = vset.pattern.permute.xlu1 %v1042_v7 }
  0x4a   :  { %354 = vperm.xlu0 %966, %v1136_v9   ;;  %222 = vperm.xlu1 %941, %v1105_v2  }
  0x4b   :  { %889 = vmatpush3.bf16.msra.mxu0 %v886_v39 }
  0x4e   :  { %969 = vset.pattern.permute.xlu0 %v1039_v1  ;;  %942 = vset.pattern.permute.xlu1 %v1044_v12 }
  0x4f   :  { %148 = vperm.xlu0 %969, %v1157_v11   ;;  %262 = vperm.xlu1 %942, %v1105_v2  }
  0x53   :  { %157 = vperm.xlu0 %969, %v1166_v13   ;;  %944 = vset.pattern.permute.xlu1 %v1043_v10 }
  0x54   :  { %342 = vperm.xlu1 %944, %v1105_v2  }
  0x57   :  { %972 = vset.pattern.permute.xlu0 %v1044_v12 }
  0x58   :  { %259 = vperm.xlu0 %972, %v1110_v3   ;;  %945 = vset.pattern.permute.xlu1 %v1045_v14 }
  0x59   :  { %65 = vperm.xlu1 %945, %v1129_v8  }
  0x5c   :  { %268 = vperm.xlu0 %972, %v1157_v11  }
  0x5d   :  { %946 = vset.pattern.permute.xlu1 %v1039_v1 }
  0x5e   :  { %145 = vperm.xlu1 %946, %v1129_v8  }
  0x60   :  { %277 = vperm.xlu0 %972, %v1166_v13  }
  0x62   :  { %947 = vset.pattern.permute.xlu1 %v1040_v5 }
  0x63   :  { %185 = vperm.xlu1 %947, %v1129_v8  }
  0x64   :  { %975 = vset.pattern.permute.xlu0 %v1045_v14 }
  0x65   :  { %59 = vperm.xlu0 %975, %v1110_v3   ;;  %v1282_v3 = vand.u32 127, %v56_v63 }
  0x67   :  { %948 = vset.pattern.permute.xlu1 %v1044_v12 }
  0x68   :  { %265 = vperm.xlu1 %948, %v1129_v8  }
  0x69   :  { %62 = vperm.xlu0 %975, %v1105_v2  }
  0x6c   :  { %949 = vset.pattern.permute.xlu1 %v1038_v0 }
  0x6d   :  { %71 = vperm.xlu0 %975, %v1117_v4   ;;  %305 = vperm.xlu1 %949, %v1129_v8  }
  0x71   :  { %80 = vperm.xlu0 %975, %v1192_v29   ;;  %950 = vset.pattern.permute.xlu1 %v1045_v14 }
  0x72   :  { %68 = vperm.xlu1 %950, %v1157_v11  }
  0x75   :  { %978 = vset.pattern.permute.xlu0 %v1040_v5 }
  0x76   :  { %182 = vperm.xlu0 %978, %v1105_v2   ;;  %951 = vset.pattern.permute.xlu1 %v1041_v6 }
  0x77   :  { %108 = vperm.xlu1 %951, %v1157_v11  }
  0x7a   :  { %191 = vperm.xlu0 %978, %v1117_v4  }
  0x7b   :  { %952 = vset.pattern.permute.xlu1 %v1040_v5 }
  0x7c   :  { %188 = vperm.xlu1 %952, %v1157_v11  }
  0x7e   :  { %200 = vperm.xlu0 %978, %v1192_v29  }
  0x80   :  { %953 = vset.pattern.permute.xlu1 %v1042_v7 }
  0x81   :  { %228 = vperm.xlu1 %953, %v1157_v11  }
  0x82   :  { %983 = vset.pattern.permute.xlu0 %v1038_v0 }
  0x83   :  { %320 = vperm.xlu0 %983, %v1192_v29  }
  0x85   :  { %954 = vset.pattern.permute.xlu1 %v1038_v0 }
  0x86   :  { %308 = vperm.xlu1 %954, %v1157_v11  }
  0x87   :  { %985 = vset.pattern.permute.xlu0 %v1043_v10 }
  0x8a   :  { %955 = vset.pattern.permute.xlu1 %v1043_v10 }
  0x8b   :  { %348 = vperm.xlu1 %955, %v1157_v11  }
  0x8f   :  { %956 = vset.pattern.permute.xlu1 %v1041_v6 }
  0x90   :  { %111 = vperm.xlu1 %956, %v1117_v4  }
  0x94   :  { %957 = vset.pattern.permute.xlu1 %v1039_v1 }
  0x95   :  { %151 = vperm.xlu1 %957, %v1117_v4  }
  0x99   :  { %958 = vset.pattern.permute.xlu1 %v1042_v7 }
  0x9a   :  { %231 = vperm.xlu1 %958, %v1117_v4  }
  0x9e   :  { %959 = vset.pattern.permute.xlu1 %v1044_v12 }
  0x9f   :  { %271 = vperm.xlu1 %959, %v1117_v4  }
  0xa3   :  { %961 = vset.pattern.permute.xlu1 %v1043_v10 }
  0xa4   :  { %351 = vperm.xlu1 %961, %v1117_v4  }
  0xa6   :  { %v1224_v40 = vpop.permute.xlu1 %139  ;;  %v1226_v41 = vpop.permute.xlu0 %302 }
  0xa7   :  { %vm162_vm5 = vcmp.eq.s32.totalorder %v1282_v3, %v1224_v40  ;;  %vm323_vm8 = vcmp.eq.s32.totalorder %v1282_v3, %v1226_v41 }
  0xa8   :  { %962 = vset.pattern.permute.xlu1 %v1045_v14  ;;  %v170_v17 = vsel %vm162_vm5, 1, %v1045_v14 }
  0xa9   :  { %74 = vperm.xlu1 %962, %v1136_v9  }
  0xaa   :  { %v1230_v42 = vpop.permute.xlu0 %311 }
  0xab   :  { %v180_v43 = vpop.permute.xlu1 %179 }
  0xac   :  { %vm202_vm1 = vcmp.eq.s32.totalorder %v1282_v3, %v180_v43 }
  0xad   :  { %964 = vset.pattern.permute.xlu1 %v1039_v1 }
  0xae   :  { %154 = vperm.xlu1 %964, %v1136_v9  }
  0xaf   :  { %v100_v44 = vpop.permute.xlu0 %99 }
  0xb0   :  { %v220_v45 = vpop.permute.xlu1 %219  ;;  %vm122_vm3 = vcmp.eq.s32.totalorder %v1282_v3, %v100_v44 }
  0xb1   :  { %vm242_vm2 = vcmp.eq.s32.totalorder %v1282_v3, %v220_v45  ;;  %v130_v11 = vsel %vm122_vm3, 1, %v1045_v14 }
  0xb2   :  { %965 = vset.pattern.permute.xlu1 %v1040_v5 }
  0xb3   :  { %194 = vperm.xlu1 %965, %v1136_v9   ;;  %v1236_v46 = vpop.permute.xlu0 %105 }
  0xb4   :  { %vm124_vm15 = vcmp.eq.s32.totalorder %v1282_v3, %v1236_v46 }
  0xb5   :  { %v300_v47 = vpop.permute.xlu1 %299  ;;  %v132_v39 = vsel %vm124_vm15, 1, %v1045_v14 }
  0xb6   :  { %vm322_vm6 = vcmp.eq.s32.totalorder %v1282_v3, %v300_v47 }
  0xb7   :  { %967 = vset.pattern.permute.xlu1 %v1044_v12  ;;  %v1239_v48 = vpop.permute.xlu0 %114  ;;  %v330_v18 = vsel %vm322_vm6, 1, %v1045_v14 }
  0xb8   :  { %274 = vperm.xlu1 %967, %v1136_v9  }
  0xba   :  { %v340_v49 = vpop.permute.xlu1 %339 }
  0xbb   :  { %vm362_vm4 = vcmp.eq.s32.totalorder %v1282_v3, %v340_v49 }
  0xbc   :  { %968 = vset.pattern.permute.xlu1 %v1038_v0  ;;  %v1243_v50 = vpop.permute.xlu0 %225 }
  0xbd   :  { %314 = vperm.xlu1 %968, %v1136_v9   ;;  %v250_v9 = vsel %vm242_vm2, 1, %v1045_v14  ;;  %vm244_vm11 = vcmp.eq.s32.totalorder %v1282_v3, %v1243_v50 }
  0xbf   :  { %v1246_v51 = vpop.permute.xlu1 %102 }
  0xc0   :  { %v1248_v52 = vpop.permute.xlu0 %234 }
  0xc1   :  { %970 = vset.pattern.permute.xlu1 %v1045_v14 }
  0xc2   :  { %77 = vperm.xlu1 %970, %v1166_v13  }
  0xc4   :  { %v1252_v53 = vpop.permute.xlu1 %142 }
  0xc5   :  { %v1254_v54 = vpop.permute.xlu0 %345  ;;  %vm163_vm5 = vcmp.eq.s32.totalorder %v1282_v3, %v1252_v53 }
  0xc6   :  { %971 = vset.pattern.permute.xlu1 %v1041_v6  ;;  %vm364_vm9 = vcmp.eq.s32.totalorder %v1282_v3, %v1254_v54  ;;  %v171_v49 = vsel %vm163_vm5, 1, %v1045_v14  ;;  %vm326_vm5 = vcmp.eq.s32.totalorder %v1282_v3, %v1230_v42 }
  0xc7   :  { %117 = vperm.xlu1 %971, %v1166_v13   ;;  %v372_v31 = vsel %vm364_vm9, 1, %v1045_v14 }
  0xc9   :  { %v1258_v55 = vpop.permute.xlu1 %222  ;;  %v1260_v56 = vpop.permute.xlu0 %354 }
  0xca   :  { %vm243_vm6 = vcmp.eq.s32.totalorder %v1282_v3, %v1258_v55 }
  0xcb   :  { %973 = vset.pattern.permute.xlu1 %v1040_v5  ;;  %v251_v53 = vsel %vm243_vm6, 1, %v1045_v14 }
  0xcc   :  { %197 = vperm.xlu1 %973, %v1166_v13  }
  0xce   :  { %v1264_v57 = vpop.permute.xlu1 %262  ;;  %v1266_v58 = vpop.permute.xlu0 %148 }
  0xcf   :  { %vm283_vm2 = vcmp.eq.s32.totalorder %v1282_v3, %v1264_v57 }
  0xd0   :  { %974 = vset.pattern.permute.xlu1 %v1042_v7  ;;  %v291_v43 = vsel %vm283_vm2, 1, %v1045_v14 }
  0xd1   :  { %237 = vperm.xlu1 %974, %v1166_v13   ;;  %v395_v57 = vadd.s32 %v291_v43, %v251_v53 }
  0xd2   :  { %v1270_v59 = vpop.permute.xlu0 %157 }
  0xd3   :  { %v1272_v60 = vpop.permute.xlu1 %342 }
  0xd4   :  { %vm363_vm14 = vcmp.eq.s32.totalorder %v1282_v3, %v1272_v60 }
  0xd5   :  { %976 = vset.pattern.permute.xlu1 %v1038_v0  ;;  %v371_v37 = vsel %vm363_vm14, 1, %v1045_v14 }
  0xd6   :  { %317 = vperm.xlu1 %976, %v1166_v13  }
  0xd7   :  { %v260_v61 = vpop.permute.xlu0 %259 }
  0xd8   :  { %v1276_v62 = vpop.permute.xlu1 %65  ;;  %vm282_vm0 = vcmp.eq.s32.totalorder %v1282_v3, %v260_v61 }
  0xd9   :  { %v290_v5 = vsel %vm282_vm0, 1, %v1045_v14  ;;  %vm84_vm0 = vcmp.eq.s32.totalorder %v1282_v3, %v1276_v62 }
  0xda   :  { %977 = vset.pattern.permute.xlu1 %v1043_v10  ;;  %v394_v16 = vadd.s32 %v290_v5, %v250_v9  ;;  %v92_v40 = vsel %vm84_vm0, 1, %v1045_v14 }
  0xdb   :  { %357 = vperm.xlu1 %977, %v1166_v13   ;;  %v1280_v2 = vpop.permute.xlu0 %268  ;;  %v370_v13 = vsel %vm362_vm4, 1, %v1045_v14  ;;  %vm123_vm4 = vcmp.eq.s32.totalorder %v1282_v3, %v1246_v51  ;;  %v380_v54 = vadd.s32 %v132_v39, %v92_v40  ;;  %v588_v39 = vld [vmem:[#allocation4 + $0x50] sm:$0xff]  ;;  %v589_v40 = vld [vmem:[#allocation4 + $0x58] sm:$0xff] }
  0xdc   :  { %v402_v21 = vadd.s32 %v370_v13, %v330_v18  ;;  %v579_v13 = vld [vmem:[#allocation4 + $0x8] sm:$0xff]  ;;  %v581_v18 = vld [vmem:[#allocation4 + $0x18] sm:$0xff] }
  0xdd   :  { %v1284_v4 = vpop.permute.xlu1 %145 }
  0xdf   :  { %979 = vset.pattern.permute.xlu1 %v1041_v6  ;;  %v1288_v0 = vpop.permute.xlu0 %277  ;;  %v210_v6 = vsel %vm202_vm1, 1, %v1045_v14  ;;  %vm164_vm1 = vcmp.eq.s32.totalorder %v1282_v3, %v1284_v4 }
  0xe0   :  { %120 = vperm.xlu1 %979, %v1192_v29   ;;  %v386_v20 = vadd.s32 %v210_v6, %v170_v17  ;;  %v172_v41 = vsel %vm164_vm1, 1, %v1045_v14 }
  0xe2   :  { %v186_v8 = vpop.permute.xlu1 %185 }
  0xe3   :  { %vm204_vm12 = vcmp.eq.s32.totalorder %v1282_v3, %v186_v8 }
  0xe4   :  { %v60_v15 = vpop.permute.xlu0 %59  ;;  %980 = vset.pattern.permute.xlu1 %v1039_v1  ;;  %v418_v1 = vadd.s32 %v402_v21, %v394_v16  ;;  %v212_v35 = vsel %vm204_vm12, 1, %v1045_v14  ;;  %v582_v21 = vld [vmem:[#allocation4 + $0x20] sm:$0xff] }
  0xe5   :  { %vm82_vm7 = vcmp.eq.s32.totalorder %v1282_v3, %v60_v15  ;;  %160 = vperm.xlu1 %980, %v1192_v29   ;;  %v388_v44 = vadd.s32 %v212_v35, %v172_v41  ;;  %v580_v15 = vld [vmem:[#allocation4 + $0x10] sm:$0xff] }
  0xe6   :  { %v90_v19 = vsel %vm82_vm7, 1, %v1045_v14 }
  0xe7   :  { %v378_v22 = vadd.s32 %v130_v11, %v90_v19  ;;  %v266_v23 = vpop.permute.xlu1 %265  ;;  %v412_v62 = vadd.s32 %v388_v44, %v380_v54  ;;  %v578_v11 = vld [vmem:[#allocation4] sm:$0xff] }
  0xe8   :  { %v63_v24 = vpop.permute.xlu0 %62  ;;  %vm284_vm13 = vcmp.eq.s32.totalorder %v1282_v3, %v266_v23  ;;  %v890_v17 = vpack.c.bf16 %v579_v13, %v578_v11 }
  0xe9   :  { %981 = vset.pattern.permute.xlu1 %v1042_v7  ;;  %v410_v25 = vadd.s32 %v386_v20, %v378_v22  ;;  %v331_v7 = vsel %vm323_vm8, 1, %v1045_v14  ;;  %v292_v36 = vsel %vm284_vm13, 1, %v1045_v14  ;;  %vm83_vm3 = vcmp.eq.s32.totalorder %v1282_v3, %v63_v24  ;;  %v583_v22 = vld [vmem:[#allocation4 + $0x28] sm:$0xff]  ;;  %v584_v24 = vld [vmem:[#allocation4 + $0x30] sm:$0xff] }
  0xea   :  { %240 = vperm.xlu1 %981, %v1192_v29   ;;  %v91_v46 = vsel %vm83_vm3, 1, %v1045_v14  ;;  %v403_v50 = vadd.s32 %v371_v37, %v331_v7  ;;  %v894_v20 = vpack.c.bf16 %v581_v18, %v580_v15  ;;  %891 = vmatprep.subr.bf16.mxu1 %v890_v17  ;;  %v898_v23 = vpack.c.bf16 %v583_v22, %v582_v21  ;;  %v586_v7 = vld [vmem:[#allocation4 + $0x40] sm:$0xff] }
  0xeb   :  { %v426_v26 = vadd.s32 %v418_v1, %v410_v25  ;;  %893 = vmatpush3.bf16.msra.mxu1 %v890_v17  ;;  %v585_v25 = vld [vmem:[#allocation4 + $0x38] sm:$0xff]  ;;  %vm165_vm8 = vcmp.eq.s32.totalorder %v1282_v3, %v1266_v58 }
  0xec   :  { %v306_v27 = vpop.permute.xlu1 %305  ;;  %v1311_v28 = vpop.permute.xlu0 %71  ;;  %v419_v63 = vadd.s32 %v403_v50, %v395_v57  ;;  %895 = vmatprep.subr.bf16.mxu1 %v894_v20  ;;  %v591_v50 = vld [vmem:[#allocation4 + $0x68] sm:$0xff] }
  0xed   :  { %vm324_vm10 = vcmp.eq.s32.totalorder %v1282_v3, %v306_v27  ;;  %v434_v30 = vcvt.s32.f32 %v426_v26  ;;  %v902_v26 = vpack.c.bf16 %v585_v25, %v584_v24  ;;  %v173_v27 = vsel %vm165_vm8, 1, %v1045_v14 }
  0xee   :  { %982 = vset.pattern.permute.xlu1 %v1044_v12  ;;  %v332_v32 = vsel %vm324_vm10, 1, %v1045_v14  ;;  %v252_v12 = vsel %vm244_vm11, 1, %v1045_v14  ;;  %vm285_vm10 = vcmp.eq.s32.totalorder %v1282_v3, %v1280_v2  ;;  %vm86_vm2 = vcmp.eq.s32.totalorder %v1282_v3, %v1311_v28 }
  0xef   :  { %280 = vperm.xlu1 %982, %v1192_v29   ;;  %802 = vmatprep.mubr.f32.mxu0 %v434_v30  ;;  %v404_v38 = vadd.s32 %v372_v31, %v332_v32  ;;  %v396_v45 = vadd.s32 %v292_v36, %v252_v12  ;;  %v587_v31 = vld [vmem:[#allocation4 + $0x48] sm:$0xff]  ;;  %v293_v58 = vsel %vm285_vm10, 1, %v1045_v14 }
  0xf0   :  { %v1329_v33 = vpop.permute.xlu0 %80  ;;  %897 = vmatpush3.bf16.msra.mxu1 %v894_v20  ;;  %v906_v36 = vpack.c.bf16 %v587_v31, %v586_v7 }
  0xf1   :  { %v1338_v34 = vpop.permute.xlu1 %68  ;;  %v420_v55 = vadd.s32 %v404_v38, %v396_v45  ;;  %899 = vmatprep.subr.bf16.mxu1 %v898_v23 }
  0xf2   :  { %vm85_vm13 = vcmp.eq.s32.totalorder %v1282_v3, %v1338_v34 }
  0xf3   :  { %984 = vset.pattern.permute.xlu1 %v1043_v10  ;;  %v131_v10 = vsel %vm123_vm4, 1, %v1045_v14  ;;  %v428_v8 = vadd.s32 %v420_v55, %v412_v62  ;;  %v93_v37 = vsel %vm85_vm13, 1, %v1045_v14  ;;  %vm247_vm13 = vcmp.eq.s32.totalorder %v1282_v3, %v1248_v52 }
  0xf4   :  { %360 = vperm.xlu1 %984, %v1192_v29   ;;  %v379_v60 = vadd.s32 %v131_v10, %v91_v46  ;;  %901 = vmatpush3.bf16.msra.mxu1 %v898_v23  ;;  %v910_v10 = vpack.c.bf16 %v589_v40, %v588_v39  ;;  %v592_v40 = vld [vmem:[#allocation4 + $0x70] sm:$0xff] }
  0xf5   :  { %v183_v47 = vpop.permute.xlu0 %182  ;;  %v436_v16 = vcvt.s32.f32 %v428_v8  ;;  %903 = vmatprep.subr.bf16.mxu1 %v902_v26 }
  0xf6   :  { %vm203_vm7 = vcmp.eq.s32.totalorder %v1282_v3, %v183_v47  ;;  %v109_v51 = vpop.permute.xlu1 %108 }
  0xf7   :  { %v211_v29 = vsel %vm203_vm7, 1, %v1045_v14  ;;  %vm125_vm11 = vcmp.eq.s32.totalorder %v1282_v3, %v109_v51 }
  0xf8   :  { %v387_v61 = vadd.s32 %v211_v29, %v171_v49  ;;  %v133_v2 = vsel %vm125_vm11, 1, %v1045_v14  ;;  %905 = vmatpush3.bf16.msra.mxu1 %v902_v26  ;;  %v590_v49 = vld [vmem:[#allocation4 + $0x60] sm:$0xff] }
  0xf9   :  { %v381_v41 = vadd.s32 %v133_v2, %v93_v37  ;;  %907 = vmatprep.subr.bf16.mxu1 %v906_v36  ;;  %v914_v54 = vpack.c.bf16 %v591_v50, %v590_v49  ;;  %v192_v57 = vpop.permute.xlu0 %191 }
  0xfa   :  { %v411_v4 = vadd.s32 %v387_v61, %v379_v60  ;;  %vm206_vm0 = vcmp.eq.s32.totalorder %v1282_v3, %v192_v57 }
  0xfb   :  { %v189_v5 = vpop.permute.xlu1 %188  ;;  %v214_v61 = vsel %vm206_vm0, 1, %v1045_v14 }
  0xfc   :  { %v427_v6 = vadd.s32 %v419_v63, %v411_v4  ;;  %vm205_vm9 = vcmp.eq.s32.totalorder %v1282_v3, %v189_v5  ;;  %909 = vmatpush3.bf16.msra.mxu1 %v906_v36  ;;  %v94_v63 = vsel %vm86_vm2, 1, %v1045_v14 }
  0xfd   :  { %v213_v30 = vsel %vm205_vm9, 1, %v1045_v14  ;;  %911 = vmatprep.subr.bf16.mxu1 %v910_v10 }
  0xfe   :  { %v435_v9 = vcvt.s32.f32 %v427_v6  ;;  %v389_v35 = vadd.s32 %v213_v30, %v173_v27  ;;  %v334_v6 = vsel %vm326_vm5, 1, %v1045_v14 }
 0x100   :  { %803 = vmatmul.mubr.f32.vlgmr.msra.gmra.mrb[0].mxu0 %v435_v9  ;;  %v229_v19 = vpop.permute.xlu1 %228  ;;  %v413_v45 = vadd.s32 %v389_v35, %v381_v41  ;;  %913 = vmatpush3.bf16.msra.mxu1 %v910_v10  ;;  %v593_v41 = vld [vmem:[#allocation4 + $0x78] sm:$0xff] }
 0x101   :  { %805 = vmatprep.mubr.f32.mxu0 %v436_v16  ;;  %vm245_vm12 = vcmp.eq.s32.totalorder %v1282_v3, %v229_v19  ;;  %915 = vmatprep.subr.bf16.mxu1 %v914_v54 }
 0x102   :  { %v253_v32 = vsel %vm245_vm12, 1, %v1045_v14  ;;  %vm127_vm12 = vcmp.eq.s32.totalorder %v1282_v3, %v1239_v48  ;;  %v255_v48 = vsel %vm247_vm13, 1, %v1045_v14  ;;  %vm89_vm13 = vcmp.eq.s32.totalorder %v1282_v3, %v1329_v33 }
 0x103   :  { %v397_v43 = vadd.s32 %v293_v58, %v253_v32  ;;  %v135_v7 = vsel %vm127_vm12, 1, %v1045_v14 }
 0x104   :  { %917 = vmatpush3.bf16.msra.mxu1 %v914_v54 }
 0x105   :  { %v309_v1 = vpop.permute.xlu1 %308 }
 0x106   :  { %vm325_vm14 = vcmp.eq.s32.totalorder %v1282_v3, %v309_v1 }
 0x107   :  { %v333_v38 = vsel %vm325_vm14, 1, %v1045_v14  ;;  %vm367_vm14 = vcmp.eq.s32.totalorder %v1282_v3, %v1260_v56 }
 0x108   :  { %v375_v31 = vsel %vm367_vm14, 1, %v1045_v14 }
 0x10a   :  { %v349_v12 = vpop.permute.xlu1 %348 }
 0x10b   :  { %vm365_vm15 = vcmp.eq.s32.totalorder %v1282_v3, %v349_v12 }
 0x10c   :  { %v373_v34 = vsel %vm365_vm15, 1, %v1045_v14 }
 0x10d   :  { %v405_v44 = vadd.s32 %v373_v34, %v333_v38 }
 0x10f   :  { %v421_v46 = vadd.s32 %v405_v44, %v397_v43  ;;  %v112_v47 = vpop.permute.xlu1 %111  ;;  %v918_v43 = vpack.c.bf16 %v593_v41, %v592_v40 }
 0x110   :  { %vm126_vm3 = vcmp.eq.s32.totalorder %v1282_v3, %v112_v47 }
 0x111   :  { %v429_v51 = vadd.s32 %v421_v46, %v413_v45  ;;  %v134_v4 = vsel %vm126_vm3, 1, %v1045_v14  ;;  %919 = vmatprep.subr.bf16.mxu1 %v918_v43 }
 0x112   :  { %v382_v13 = vadd.s32 %v134_v4, %v94_v63  ;;  %921 = vmatpush3.bf16.msra.mxu1 %v918_v43 }
 0x113   :  { %v437_v53 = vcvt.s32.f32 %v429_v51 }
 0x114   :  { %v152_v55 = vpop.permute.xlu1 %151 }
 0x115   :  { %806 = vmatmul.mubr.f32.gmra.mrb[2].mxu0 %v437_v53  ;;  %vm166_vm1 = vcmp.eq.s32.totalorder %v1282_v3, %v152_v55 }
 0x116   :  { %v174_v62 = vsel %vm166_vm1, 1, %v1045_v14  ;;  %vm168_vm1 = vcmp.eq.s32.totalorder %v1282_v3, %v1270_v59 }
 0x117   :  { %v390_v8 = vadd.s32 %v214_v61, %v174_v62  ;;  %v176_v46 = vsel %vm168_vm1, 1, %v1045_v14 }
 0x119   :  { %v232_v29 = vpop.permute.xlu1 %231  ;;  %v414_v16 = vadd.s32 %v390_v8, %v382_v13 }
 0x11a   :  { %vm246_vm6 = vcmp.eq.s32.totalorder %v1282_v3, %v232_v29 }
 0x11b   :  { %v254_v9 = vsel %vm246_vm6, 1, %v1045_v14 }
 0x11e   :  { %v272_v60 = vpop.permute.xlu1 %271 }
 0x11f   :  { %vm286_vm4 = vcmp.eq.s32.totalorder %v1282_v3, %v272_v60 }
 0x120   :  { %v294_v5 = vsel %vm286_vm4, 1, %v1045_v14  ;;  %vm288_vm4 = vcmp.eq.s32.totalorder %v1282_v3, %v1288_v0 }
 0x121   :  { %v398_v42 = vadd.s32 %v294_v5, %v254_v9  ;;  %v296_v50 = vsel %vm288_vm4, 1, %v1045_v14  ;;  %v201_v5 = vpop.permute.xlu0 %200 }
 0x123   :  { %v352_v28 = vpop.permute.xlu1 %351 }
 0x124   :  { %vm366_vm7 = vcmp.eq.s32.totalorder %v1282_v3, %v352_v28 }
 0x125   :  { %v374_v11 = vsel %vm366_vm7, 1, %v1045_v14  ;;  %v321_v8 = vpop.permute.xlu0 %320 }
 0x126   :  { %v406_v15 = vadd.s32 %v374_v11, %v334_v6  ;;  %vm329_vm12 = vcmp.eq.s32.totalorder %v1282_v3, %v321_v8 }
 0x128   :  { %v422_v17 = vadd.s32 %v406_v15, %v398_v42  ;;  %v75_v18 = vpop.permute.xlu1 %74  ;;  %v337_v15 = vsel %vm329_vm12, 1, %v1045_v14 }
 0x129   :  { %vm87_vm9 = vcmp.eq.s32.totalorder %v1282_v3, %v75_v18  ;;  %v97_v18 = vsel %vm89_vm13, 1, %v1045_v14 }
 0x12a   :  { %v430_v19 = vadd.s32 %v422_v17, %v414_v16  ;;  %v95_v25 = vsel %vm87_vm9, 1, %v1045_v14 }
 0x12b   :  { %v383_v58 = vadd.s32 %v135_v7, %v95_v25 }
 0x12c   :  { %v438_v20 = vcvt.s32.f32 %v430_v19 }
 0x12d   :  { %v155_v21 = vpop.permute.xlu1 %154 }
 0x12e   :  { %808 = vmatprep.mubr.f32.mxu0 %v438_v20  ;;  %vm167_vm10 = vcmp.eq.s32.totalorder %v1282_v3, %v155_v21 }
 0x12f   :  { %v175_v1 = vsel %vm167_vm10, 1, %v1045_v14 }
 0x132   :  { %v195_v22 = vpop.permute.xlu1 %194 }
 0x133   :  { %vm207_vm8 = vcmp.eq.s32.totalorder %v1282_v3, %v195_v22 }
 0x134   :  { %v215_v24 = vsel %vm207_vm8, 1, %v1045_v14  ;;  %vm209_vm8 = vcmp.eq.s32.totalorder %v1282_v3, %v201_v5 }
 0x135   :  { %v391_v30 = vadd.s32 %v215_v24, %v175_v1  ;;  %v217_v9 = vsel %vm209_vm8, 1, %v1045_v14 }
 0x137   :  { %v275_v23 = vpop.permute.xlu1 %274  ;;  %v415_v32 = vadd.s32 %v391_v30, %v383_v58 }
 0x138   :  { %vm287_vm11 = vcmp.eq.s32.totalorder %v1282_v3, %v275_v23 }
 0x139   :  { %v295_v26 = vsel %vm287_vm11, 1, %v1045_v14 }
 0x13a   :  { %v399_v56 = vadd.s32 %v295_v26, %v255_v48  ;;  %v720_v26 = vld [vmem:[%s1487_s2] ss:$0 sm:$0xff] }
 0x13c   :  { %v315_v27 = vpop.permute.xlu1 %314 }
 0x13d   :  { %vm327_vm15 = vcmp.eq.s32.totalorder %v1282_v3, %v315_v27 }
 0x13e   :  { %v335_v52 = vsel %vm327_vm15, 1, %v1045_v14 }
 0x13f   :  { %v407_v2 = vadd.s32 %v375_v31, %v335_v52 }
 0x141   :  { %v423_v12 = vadd.s32 %v407_v2, %v399_v56  ;;  %v78_v35 = vpop.permute.xlu1 %77 }
 0x142   :  { %vm88_vm5 = vcmp.eq.s32.totalorder %v1282_v3, %v78_v35 }
 0x143   :  { %v431_v36 = vadd.s32 %v423_v12, %v415_v32  ;;  %v96_v51 = vsel %vm88_vm5, 1, %v1045_v14 }
 0x145   :  { %v439_v37 = vcvt.s32.f32 %v431_v36 }
 0x146   :  { %v118_v38 = vpop.permute.xlu1 %117 }
 0x147   :  { %809 = vmatmul.mubr.f32.gmra.mrb[4].mxu0 %v439_v37  ;;  %vm128_vm2 = vcmp.eq.s32.totalorder %v1282_v3, %v118_v38 }
 0x148   :  { %v136_v47 = vsel %vm128_vm2, 1, %v1045_v14 }
 0x149   :  { %v384_v54 = vadd.s32 %v136_v47, %v96_v51 }
 0x14b   :  { %v198_v34 = vpop.permute.xlu1 %197 }
 0x14c   :  { %vm208_vm0 = vcmp.eq.s32.totalorder %v1282_v3, %v198_v34 }
 0x14d   :  { %v216_v45 = vsel %vm208_vm0, 1, %v1045_v14 }
 0x14e   :  { %v392_v49 = vadd.s32 %v216_v45, %v176_v46  ;;  %v721_v46 = vld [vmem:[%s1489_s4] ss:$0 sm:$0xff] }
 0x150   :  { %v238_v39 = vpop.permute.xlu1 %237  ;;  %v416_v57 = vadd.s32 %v392_v49, %v384_v54 }
 0x151   :  { %vm248_vm3 = vcmp.eq.s32.totalorder %v1282_v3, %v238_v39 }
 0x152   :  { %v256_v59 = vsel %vm248_vm3, 1, %v1045_v14 }
 0x153   :  { %v400_v55 = vadd.s32 %v296_v50, %v256_v59 }
 0x155   :  { %v318_v44 = vpop.permute.xlu1 %317 }
 0x156   :  { %vm328_vm6 = vcmp.eq.s32.totalorder %v1282_v3, %v318_v44 }
 0x157   :  { %v336_v0 = vsel %vm328_vm6, 1, %v1045_v14 }
 0x15a   :  { %v358_v10 = vpop.permute.xlu1 %357 }
 0x15b   :  { %vm368_vm7 = vcmp.eq.s32.totalorder %v1282_v3, %v358_v10 }
 0x15c   :  { %v376_v53 = vsel %vm368_vm7, 1, %v1045_v14 }
 0x15d   :  { %v408_v29 = vadd.s32 %v376_v53, %v336_v0 }
 0x15f   :  { %v424_v60 = vadd.s32 %v408_v29, %v400_v55  ;;  %v121_v61 = vpop.permute.xlu1 %120 }
 0x160   :  { %vm129_vm10 = vcmp.eq.s32.totalorder %v1282_v3, %v121_v61 }
 0x161   :  { %v432_v62 = vadd.s32 %v424_v60, %v416_v57  ;;  %v137_v13 = vsel %vm129_vm10, 1, %v1045_v14 }
 0x162   :  { %v385_v21 = vadd.s32 %v137_v13, %v97_v18 }
 0x163   :  { %v440_v63 = vcvt.s32.f32 %v432_v62 }
 0x164   :  { %v161_v4 = vpop.permute.xlu1 %160 }
 0x165   :  { %811 = vmatprep.mubr.f32.mxu0 %v440_v63  ;;  %vm169_vm9 = vcmp.eq.s32.totalorder %v1282_v3, %v161_v4 }
 0x166   :  { %v177_v11 = vsel %vm169_vm9, 1, %v1045_v14 }
 0x167   :  { %v393_v17 = vadd.s32 %v217_v9, %v177_v11 }
 0x169   :  { %v241_v28 = vpop.permute.xlu1 %240  ;;  %v417_v23 = vadd.s32 %v393_v17, %v385_v21 }
 0x16a   :  { %vm249_vm14 = vcmp.eq.s32.totalorder %v1282_v3, %v241_v28 }
 0x16b   :  { %v257_v19 = vsel %vm249_vm14, 1, %v1045_v14 }
 0x16e   :  { %v281_v6 = vpop.permute.xlu1 %280 }
 0x16f   :  { %vm289_vm11 = vcmp.eq.s32.totalorder %v1282_v3, %v281_v6 }
 0x170   :  { %v297_v42 = vsel %vm289_vm11, 1, %v1045_v14 }
 0x171   :  { %v401_v33 = vadd.s32 %v297_v42, %v257_v19 }
 0x173   :  { %v361_v16 = vpop.permute.xlu1 %360 }
 0x174   :  { %vm369_vm15 = vcmp.eq.s32.totalorder %v1282_v3, %v361_v16 }
 0x175   :  { %v377_v20 = vsel %vm369_vm15, 1, %v1045_v14 }
 0x176   :  { %v409_v22 = vadd.s32 %v377_v20, %v337_v15 }
 0x178   :  { %v425_v24 = vadd.s32 %v409_v22, %v401_v33 }
 0x17a   :  { %v433_v25 = vadd.s32 %v425_v24, %v417_v23 }
 0x17c   :  { %v441_v1 = vcvt.s32.f32 %v433_v25 }
 0x17e   :  { %812 = vmatmul.mubr.f32.gmra.mrb[6].mxu0 %v441_v1 }
 0x1d3   :  { %v804_v27 = vpop.f32.mrb[0].mxu0 }
 0x1d4   :  { %v537_v3 = vadd.f32 %v804_v27, %v720_v26  ;;  %v531_v30 = vpop.f32.mrb[1].mxu0 }
 0x1d5   :  { %v532_v7 = vadd.f32 %v720_v26, %v531_v30 }
 0x1d6   :  { %v571_v31 = vmax.f32 %v537_v3, 0.0 }
 0x1d7   :  { %v570_v48 = vmax.f32 %v532_v7, 0.0 }
 0x1d9   :  { %846 = vmatprep.mubr.f32.mxu1 %v570_v48 }
 0x1da   :  { %847 = vmatmul.mubr.f32.vlgmr.msra.gmra.mrb[0].mxu1 %v571_v31 }
 0x1e8   :  { %v807_v14 = vpop.f32.mrb[2].mxu0 }
 0x1e9   :  { %v547_v52 = vadd.f32 %v807_v14, %v720_v26  ;;  %v541_v58 = vpop.f32.mrb[3].mxu0 }
 0x1ea   :  { %v542_v56 = vadd.f32 %v720_v26, %v541_v58 }
 0x1eb   :  { %v573_v32 = vmax.f32 %v547_v52, 0.0 }
 0x1ec   :  { %v572_v2 = vmax.f32 %v542_v56, 0.0 }
 0x1ee   :  { %849 = vmatprep.mubr.f32.mxu1 %v572_v2 }
 0x1ef   :  { %850 = vmatmul.mubr.f32.gmra.mrb[2].mxu1 %v573_v32 }
 0x21a   :  { %v810_v12 = vpop.f32.mrb[4].mxu0 }
 0x21b   :  { %v557_v35 = vadd.f32 %v810_v12, %v720_v26  ;;  %v551_v36 = vpop.f32.mrb[5].mxu0 }
 0x21c   :  { %v552_v37 = vadd.f32 %v720_v26, %v551_v36 }
 0x21d   :  { %v575_v34 = vmax.f32 %v557_v35, 0.0 }
 0x21e   :  { %v574_v38 = vmax.f32 %v552_v37, 0.0 }
 0x220   :  { %852 = vmatprep.mubr.f32.mxu1 %v574_v38 }
 0x221   :  { %853 = vmatmul.mubr.f32.gmra.mrb[4].mxu1 %v575_v34 }
 0x251   :  { %v813_v39 = vpop.f32.mrb[6].mxu0 }
 0x252   :  { %v567_v40 = vadd.f32 %v813_v39, %v720_v26  ;;  %v561_v41 = vpop.f32.mrb[7].mxu0 }
 0x253   :  { %v562_v43 = vadd.f32 %v720_v26, %v561_v41 }
 0x254   :  { %v577_v45 = vmax.f32 %v567_v40, 0.0 }
 0x255   :  { %v576_v44 = vmax.f32 %v562_v43, 0.0 }
 0x257   :  { %855 = vmatprep.mubr.f32.mxu1 %v576_v44 }
 0x258   :  { %856 = vmatmul.mubr.f32.gmra.mrb[6].mxu1 %v577_v45 }
 0x2ad   :  { %v848_v47 = vpop.f32.mrb[0].mxu1 }
 0x2ae   :  { %v673_v59 = vadd.f32 %v848_v47, %v721_v46  ;;  %v667_v10 = vpop.f32.mrb[1].mxu1 }
 0x2af   :  { %v668_v49 = vadd.f32 %v721_v46, %v667_v10 }
 0x2b0   :  { %707 = vst [vmem:[%s1490_s5 + $0x8] sm:$0xff] %v673_v59 }
 0x2b1   :  { %706 = vst [vmem:[%s1490_s5] sm:$0xff] %v668_v49 }
 0x2c2   :  { %v851_v50 = vpop.f32.mrb[2].mxu1 }
 0x2c3   :  { %v683_v51 = vadd.f32 %v851_v50, %v721_v46  ;;  %v677_v0 = vpop.f32.mrb[3].mxu1 }
 0x2c4   :  { %v678_v53 = vadd.f32 %v721_v46, %v677_v0 }
 0x2c5   :  { %709 = vst [vmem:[%s1490_s5 + $0x18] sm:$0xff] %v683_v51 }
 0x2c6   :  { %708 = vst [vmem:[%s1490_s5 + $0x10] sm:$0xff] %v678_v53 }
 0x2f4   :  { %v854_v54 = vpop.f32.mrb[4].mxu1 }
 0x2f5   :  { %v693_v55 = vadd.f32 %v854_v54, %v721_v46  ;;  %v687_v29 = vpop.f32.mrb[5].mxu1 }
 0x2f6   :  { %v688_v57 = vadd.f32 %v721_v46, %v687_v29 }
 0x2f7   :  { %711 = vst [vmem:[%s1490_s5 + $0x28] sm:$0xff] %v693_v55 }
 0x2f8   :  { %710 = vst [vmem:[%s1490_s5 + $0x20] sm:$0xff] %v688_v57 }
 0x32b   :  { %v857_v60 = vpop.f32.mrb[6].mxu1 }
 0x32c   :  { %v703_v61 = vadd.f32 %v857_v60, %v721_v46  ;;  %v697_v62 = vpop.f32.mrb[7].mxu1 }
 0x32d   :  { %v698_v63 = vadd.f32 %v721_v46, %v697_v62 }
 0x32e   :  { %713 = vst [vmem:[%s1490_s5 + $0x38] sm:$0xff] %v703_v61 }
 0x32f   :  { %712 = vst [vmem:[%s1490_s5 + $0x30] sm:$0xff] %v698_v63 }
 0x330   :  { %718 = vsyncpa [#allocation3], 1 }
 0x331   :  { %719 = vsyncpa [#allocation5], 1 }

</bundles_post_ra>
